<compile_context>
chip_gen: v5e
topology: v5e:2x2
jax: 0.10.0
libtpu: 0.0.40
codegen_flags: <defaults>
</compile_context>

<pallas_src>
import jax
import jax.numpy as jnp
from jax.experimental import pallas as pl
from jax.experimental.pallas import tpu as pltpu

# ---------------------------------------------------------------------------
# Shapes
# ---------------------------------------------------------------------------
B = 128                   # total batch (amortizes per-call overhead)
B_TILE = 32               # sequences per grid step (multiple of 8 sublanes)
C_IN = 2                  # input channels (Linear(2, 1) forces 2 channels)
C_HID = 2                 # wires=2 -> 2 "quantum" output channels
L = 128                   # sequence length == lane width (lane-dense)
D1, D2 = 1, 2             # dilations of qconv1d_1 / qconv1d_2
K = 2                     # kernel size (= wires) for qconv layers 1 & 2
L1 = L - D1 * (K - 1)     # length after qconv1d_1 (valid conv)      = 127
L2 = L1 - D2 * (K - 1)    # length after qconv1d_2 (valid conv)      = 125
CROP = L - L2             # crop offset for the skip path             = 3

# ---------------------------------------------------------------------------
# Packed parameter layout (single flat f32 vector, lives in SMEM)
# ---------------------------------------------------------------------------
OFF_W1, OFF_B1 = 0, 8        # w1: (2 out, 2 in, 2 taps) = 8 ; b1: 2
OFF_W2, OFF_B2 = 10, 18      # w2: 8 ; b2: 2
OFF_W3, OFF_B3 = 20, 24      # w3: (2 out, 2 in) = 4 ; b3: 2
OFF_WSE1, OFF_BSE1 = 26, 30  # SE hidden: 4 + 2
OFF_WSE2, OFF_BSE2 = 32, 36  # SE gate:   4 + 2
OFF_WLIN, OFF_BLIN = 38, 40  # Linear(2, 1): 2 + 1
N_PARAMS = 41


# ---------------------------------------------------------------------------
# Kernel
# ---------------------------------------------------------------------------
def qtcn_kernel(p_ref, x_ref, o_ref):
    # TODO(synk): Qconv1d/Qconv1d_2/Qconv1d_3/QSE are PennyLane variational
    # circuits with no Pallas equivalent; they are replaced by the classical
    # surrogates below (dilated valid convs + tanh readout, SE gate).
    x0 = x_ref[0]                        # (B_TILE, L) channel 0, lanes = time
    x1 = x_ref[1]                        # (B_TILE, L) channel 1

    def shift(v, d):
        # v[t + d] at lane t (tail lanes wrap; they are outside the valid
        # window and never reach the output).  XLU rotate, full lane width.
        return pltpu.roll(v, L - d, axis=1)

    def lincomb(feats, w_off, o, b_off):
        # sum_i w[o, i] * feats[i] + b[o], fused full-vreg MAC chain.
        n = len(feats)
        acc = feats[0] * p_ref[w_off + o * n]
        for i in range(1, n):
            acc = acc + feats[i] * p_ref[w_off + o * n + i]
        return acc + p_ref[b_off + o]

    # qconv1d_1: dilation 1, kernel 2, 2 -> 2 channels, bounded readout.
    t1 = [x0, shift(x0, D1), x1, shift(x1, D1)]
    h1_0 = jnp.tanh(lincomb(t1, OFF_W1, 0, OFF_B1))
    h1_1 = jnp.tanh(lincomb(t1, OFF_W1, 1, OFF_B1))

    # qconv1d_2: dilation 2, kernel 2, 2 -> 2 channels.  Valid at lanes [0, L2).
    t2 = [h1_0, shift(h1_0, D2), h1_1, shift(h1_1, D2)]
    h2_0 = jnp.tanh(lincomb(t2, OFF_W2, 0, OFF_B2))
    h2_1 = jnp.tanh(lincomb(t2, OFF_W2, 1, OFF_B2))

    # qconv1d_3: pointwise (kernel 1) skip conv on the raw input.
    t3 = [x0, x1]
    h3_0 = jnp.tanh(lincomb(t3, OFF_W3, 0, OFF_B3))
    h3_1 = jnp.tanh(lincomb(t3, OFF_W3, 1, OFF_B3))

    # QSE squeeze: mean over the cropped skip window x[:, :, -L2:]
    # (lanes [CROP, L)), computed with a lane mask + cross-lane reduce.
    lane = jax.lax.broadcasted_iota(jnp.int32, (B_TILE, L), 1)
    skip_mask = lane >= CROP
    inv_l2 = 1.0 / L2
    s0 = jnp.sum(jnp.where(skip_mask, h3_0, 0.0), axis=1, keepdims=True) * inv_l2
    s1 = jnp.sum(jnp.where(skip_mask, h3_1, 0.0), axis=1, keepdims=True) * inv_l2

    # QSE excite: 2 -> 2 ReLU hidden, 2 -> 2 sigmoid channel gate. (B_TILE, 1)
    e0 = jnp.maximum(p_ref[OFF_WSE1 + 0] * s0 + p_ref[OFF_WSE1 + 1] * s1
                     + p_ref[OFF_BSE1 + 0], 0.0)
    e1 = jnp.maximum(p_ref[OFF_WSE1 + 2] * s0 + p_ref[OFF_WSE1 + 3] * s1
                     + p_ref[OFF_BSE1 + 1], 0.0)
    g0 = jax.nn.sigmoid(p_ref[OFF_WSE2 + 0] * e0 + p_ref[OFF_WSE2 + 1] * e1
                        + p_ref[OFF_BSE2 + 0])
    g1 = jax.nn.sigmoid(p_ref[OFF_WSE2 + 2] * e0 + p_ref[OFF_WSE2 + 3] * e1
                        + p_ref[OFF_BSE2 + 1])

    # Residual add: align h2's valid window [0, L2) with the skip window
    # [CROP, L) via a lane roll (XLU), then add the SE-gated skip path.
    # Lanes [CROP, L) now hold the full residual output; lane L-1 is x1[:,:,-1].
    y0 = pltpu.roll(h2_0, CROP, axis=1) + g0 * h3_0
    y1 = pltpu.roll(h2_1, CROP, axis=1) + g1 * h3_1

    # Linear(2, 1) applied at every lane -> lane-dense, unmasked store.
    o_ref[...] = (p_ref[OFF_WLIN + 0] * y0 + p_ref[OFF_WLIN + 1] * y1
                  + p_ref[OFF_BLIN])


# ---------------------------------------------------------------------------
# Wrapper
# ---------------------------------------------------------------------------
def qtcn_forward(x, params_flat):
    """x: (B, C_IN, L) f32, params_flat: (N_PARAMS,) f32 -> (B, 1) f32."""
    b, c, l = x.shape
    assert c == C_IN and l == L and b % B_TILE == 0
    # Layout plumbing: channels leading, batch on sublanes, time on lanes.
    x_cbl = jnp.transpose(x, (1, 0, 2))                       # (C_IN, B, L)

    out_slab = pl.pallas_call(
        qtcn_kernel,
        out_shape=jax.ShapeDtypeStruct((b, L), jnp.float32),
        grid_spec=pltpu.PrefetchScalarGridSpec(
            num_scalar_prefetch=1,                            # packed params
            grid=(b // B_TILE,),
            in_specs=[
                pl.BlockSpec((C_IN, B_TILE, L), lambda i, p: (0, i, 0)),
            ],
            out_specs=pl.BlockSpec((B_TILE, L), lambda i, p: (i, 0)),
        ),
        compiler_params=pltpu.CompilerParams(
            dimension_semantics=("parallel",),                # 2 TCs on v7x
            vmem_limit_bytes=32 * 1024 * 1024,
        ),
    )(params_flat, x_cbl)
    # Last valid timestep of the residual output == model's scalar prediction.
    return out_slab[:, L - 1:L]                               # (B, 1)


# ---------------------------------------------------------------------------
# Pure-JAX reference of the same surrogate (for correctness check)
# ---------------------------------------------------------------------------
def qtcn_reference(x, p):
    def conv_k2(inp, w_off, b_off, d, c_in):
        lx = inp.shape[2]
        a = inp[:, :, : lx - d]
        bt = inp[:, :, d:]
        outs = []
        for o in range(C_HID):
            acc = p[b_off + o]
            for i in range(c_in):
                acc = (acc + p[w_off + o * (2 * c_in) + 2 * i] * a[:, i, :]
                       + p[w_off + o * (2 * c_in) + 2 * i + 1] * bt[:, i, :])
            outs.append(acc)
        return jnp.stack(outs, axis=1)

    h1 = jnp.tanh(conv_k2(x, OFF_W1, OFF_B1, D1, C_IN))
    h2 = jnp.tanh(conv_k2(h1, OFF_W2, OFF_B2, D2, C_HID))
    outs = []
    for o in range(C_HID):
        acc = p[OFF_B3 + o]
        for i in range(C_IN):
            acc = acc + p[OFF_W3 + o * C_IN + i] * x[:, i, :]
        outs.append(acc)
    h3 = jnp.tanh(jnp.stack(outs, axis=1))

    l2 = h2.shape[2]
    x_skip = h3[:, :, -l2:]
    s = jnp.mean(x_skip, axis=2)                              # (B, 2)
    e = [jnp.maximum(p[OFF_BSE1 + o]
                     + p[OFF_WSE1 + o * C_HID + 0] * s[:, 0]
                     + p[OFF_WSE1 + o * C_HID + 1] * s[:, 1], 0.0)
         for o in range(C_HID)]
    g = [jax.nn.sigmoid(p[OFF_BSE2 + o]
                        + p[OFF_WSE2 + o * C_HID + 0] * e[0]
                        + p[OFF_WSE2 + o * C_HID + 1] * e[1])
         for o in range(C_HID)]
    gate = jnp.stack(g, axis=1)                               # (B, 2)
    y = h2 + x_skip * gate[:, :, None]
    feat = y[:, :, -1]                                        # (B, 2)
    out = p[OFF_BLIN] + p[OFF_WLIN] * feat[:, 0] + p[OFF_WLIN + 1] * feat[:, 1]
    return out[:, None]


def init_params(key):
    return (0.1 * jax.random.normal(key, (N_PARAMS,))).astype(jnp.float32)


if __name__ == "__main__":
    key = jax.random.PRNGKey(0)
    kx, kp = jax.random.split(key)
    x = jax.random.normal(kx, (B, C_IN, L), dtype=jnp.float32)
    params = init_params(kp)

    out = qtcn_forward(x, params)
    jax.block_until_ready(out)
    assert out.shape == (B, 1) and out.dtype == jnp.float32

    ref = qtcn_reference(x, params)
    assert bool(jnp.allclose(out, ref, atol=1e-3, rtol=1e-3))

    print("KERNEL_OK")
</pallas_src>

<mosaic_0001>
module attributes {stable_mosaic.version = 11 : i64} {
  func.func @qtcn_kernel(%arg0: i32, %arg1: memref<41xf32, #tpu.memory_space<smem>>, %arg2: memref<2x32x128xf32, #tpu.memory_space<vmem>>, %arg3: memref<32x128xf32, #tpu.memory_space<vmem>>) attributes {dimension_semantics = [#tpu.dimension_semantics<parallel>], iteration_bounds = array<i64: 4>, scalar_prefetch = 1 : i64, scratch_operands = 0 : i64, tpu.core_type = #tpu.core_type<tc>, window_params = [{transform_indices = @transform_0, window_bounds = array<i64: 2, 32, 128>}, {transform_indices = @transform_1, window_bounds = array<i64: 32, 128>}]} {
    %c0 = arith.constant 0 : index
    %c0_0 = arith.constant 0 : index
    %c0_1 = arith.constant 0 : index
    %0 = vector.load %arg2[%c0, %c0_0, %c0_1] : memref<2x32x128xf32, #tpu.memory_space<vmem>>, vector<1x32x128xf32>
    %1 = vector.shape_cast %0 : vector<1x32x128xf32> to vector<32x128xf32>
    %c1 = arith.constant 1 : index
    %c0_2 = arith.constant 0 : index
    %c0_3 = arith.constant 0 : index
    %2 = vector.load %arg2[%c1, %c0_2, %c0_3] : memref<2x32x128xf32, #tpu.memory_space<vmem>>, vector<1x32x128xf32>
    %3 = vector.shape_cast %2 : vector<1x32x128xf32> to vector<32x128xf32>
    %c127_i32 = arith.constant 127 : i32
    %4 = tpu.dynamic_rotate %1 by %c127_i32 dim 1 : vector<32x128xf32>, i32 -> vector<32x128xf32>
    %c127_i32_4 = arith.constant 127 : i32
    %5 = tpu.dynamic_rotate %3 by %c127_i32_4 dim 1 : vector<32x128xf32>, i32 -> vector<32x128xf32>
    %c0_5 = arith.constant 0 : index
    %6 = memref.load %arg1[%c0_5] : memref<41xf32, #tpu.memory_space<smem>>
    %7 = vector.broadcast %6 : f32 to vector<32x128xf32>
    %8 = arith.mulf %1, %7 : vector<32x128xf32>
    %c1_6 = arith.constant 1 : index
    %9 = memref.load %arg1[%c1_6] : memref<41xf32, #tpu.memory_space<smem>>
    %10 = vector.broadcast %9 : f32 to vector<32x128xf32>
    %11 = arith.mulf %4, %10 : vector<32x128xf32>
    %12 = arith.addf %8, %11 : vector<32x128xf32>
    %c2 = arith.constant 2 : index
    %13 = memref.load %arg1[%c2] : memref<41xf32, #tpu.memory_space<smem>>
    %14 = vector.broadcast %13 : f32 to vector<32x128xf32>
    %15 = arith.mulf %3, %14 : vector<32x128xf32>
    %16 = arith.addf %12, %15 : vector<32x128xf32>
    %c3 = arith.constant 3 : index
    %17 = memref.load %arg1[%c3] : memref<41xf32, #tpu.memory_space<smem>>
    %18 = vector.broadcast %17 : f32 to vector<32x128xf32>
    %19 = arith.mulf %5, %18 : vector<32x128xf32>
    %20 = arith.addf %16, %19 : vector<32x128xf32>
    %c8 = arith.constant 8 : index
    %21 = memref.load %arg1[%c8] : memref<41xf32, #tpu.memory_space<smem>>
    %22 = vector.broadcast %21 : f32 to vector<32x128xf32>
    %23 = arith.addf %20, %22 : vector<32x128xf32>
    %24 = math.tanh %23 : vector<32x128xf32>
    %c4 = arith.constant 4 : index
    %25 = memref.load %arg1[%c4] : memref<41xf32, #tpu.memory_space<smem>>
    %26 = vector.broadcast %25 : f32 to vector<32x128xf32>
    %27 = arith.mulf %1, %26 : vector<32x128xf32>
    %c5 = arith.constant 5 : index
    %28 = memref.load %arg1[%c5] : memref<41xf32, #tpu.memory_space<smem>>
    %29 = vector.broadcast %28 : f32 to vector<32x128xf32>
    %30 = arith.mulf %4, %29 : vector<32x128xf32>
    %31 = arith.addf %27, %30 : vector<32x128xf32>
    %c6 = arith.constant 6 : index
    %32 = memref.load %arg1[%c6] : memref<41xf32, #tpu.memory_space<smem>>
    %33 = vector.broadcast %32 : f32 to vector<32x128xf32>
    %34 = arith.mulf %3, %33 : vector<32x128xf32>
    %35 = arith.addf %31, %34 : vector<32x128xf32>
    %c7 = arith.constant 7 : index
    %36 = memref.load %arg1[%c7] : memref<41xf32, #tpu.memory_space<smem>>
    %37 = vector.broadcast %36 : f32 to vector<32x128xf32>
    %38 = arith.mulf %5, %37 : vector<32x128xf32>
    %39 = arith.addf %35, %38 : vector<32x128xf32>
    %c9 = arith.constant 9 : index
    %40 = memref.load %arg1[%c9] : memref<41xf32, #tpu.memory_space<smem>>
    %41 = vector.broadcast %40 : f32 to vector<32x128xf32>
    %42 = arith.addf %39, %41 : vector<32x128xf32>
    %43 = math.tanh %42 : vector<32x128xf32>
    %c126_i32 = arith.constant 126 : i32
    %44 = tpu.dynamic_rotate %24 by %c126_i32 dim 1 : vector<32x128xf32>, i32 -> vector<32x128xf32>
    %c126_i32_7 = arith.constant 126 : i32
    %45 = tpu.dynamic_rotate %43 by %c126_i32_7 dim 1 : vector<32x128xf32>, i32 -> vector<32x128xf32>
    %c10 = arith.constant 10 : index
    %46 = memref.load %arg1[%c10] : memref<41xf32, #tpu.memory_space<smem>>
    %47 = vector.broadcast %46 : f32 to vector<32x128xf32>
    %48 = arith.mulf %24, %47 : vector<32x128xf32>
    %c11 = arith.constant 11 : index
    %49 = memref.load %arg1[%c11] : memref<41xf32, #tpu.memory_space<smem>>
    %50 = vector.broadcast %49 : f32 to vector<32x128xf32>
    %51 = arith.mulf %44, %50 : vector<32x128xf32>
    %52 = arith.addf %48, %51 : vector<32x128xf32>
    %c12 = arith.constant 12 : index
    %53 = memref.load %arg1[%c12] : memref<41xf32, #tpu.memory_space<smem>>
    %54 = vector.broadcast %53 : f32 to vector<32x128xf32>
    %55 = arith.mulf %43, %54 : vector<32x128xf32>
    %56 = arith.addf %52, %55 : vector<32x128xf32>
    %c13 = arith.constant 13 : index
    %57 = memref.load %arg1[%c13] : memref<41xf32, #tpu.memory_space<smem>>
    %58 = vector.broadcast %57 : f32 to vector<32x128xf32>
    %59 = arith.mulf %45, %58 : vector<32x128xf32>
    %60 = arith.addf %56, %59 : vector<32x128xf32>
    %c18 = arith.constant 18 : index
    %61 = memref.load %arg1[%c18] : memref<41xf32, #tpu.memory_space<smem>>
    %62 = vector.broadcast %61 : f32 to vector<32x128xf32>
    %63 = arith.addf %60, %62 : vector<32x128xf32>
    %64 = math.tanh %63 : vector<32x128xf32>
    %c14 = arith.constant 14 : index
    %65 = memref.load %arg1[%c14] : memref<41xf32, #tpu.memory_space<smem>>
    %66 = vector.broadcast %65 : f32 to vector<32x128xf32>
    %67 = arith.mulf %24, %66 : vector<32x128xf32>
    %c15 = arith.constant 15 : index
    %68 = memref.load %arg1[%c15] : memref<41xf32, #tpu.memory_space<smem>>
    %69 = vector.broadcast %68 : f32 to vector<32x128xf32>
    %70 = arith.mulf %44, %69 : vector<32x128xf32>
    %71 = arith.addf %67, %70 : vector<32x128xf32>
    %c16 = arith.constant 16 : index
    %72 = memref.load %arg1[%c16] : memref<41xf32, #tpu.memory_space<smem>>
    %73 = vector.broadcast %72 : f32 to vector<32x128xf32>
    %74 = arith.mulf %43, %73 : vector<32x128xf32>
    %75 = arith.addf %71, %74 : vector<32x128xf32>
    %c17 = arith.constant 17 : index
    %76 = memref.load %arg1[%c17] : memref<41xf32, #tpu.memory_space<smem>>
    %77 = vector.broadcast %76 : f32 to vector<32x128xf32>
    %78 = arith.mulf %45, %77 : vector<32x128xf32>
    %79 = arith.addf %75, %78 : vector<32x128xf32>
    %c19 = arith.constant 19 : index
    %80 = memref.load %arg1[%c19] : memref<41xf32, #tpu.memory_space<smem>>
    %81 = vector.broadcast %80 : f32 to vector<32x128xf32>
    %82 = arith.addf %79, %81 : vector<32x128xf32>
    %83 = math.tanh %82 : vector<32x128xf32>
    %c20 = arith.constant 20 : index
    %84 = memref.load %arg1[%c20] : memref<41xf32, #tpu.memory_space<smem>>
    %85 = vector.broadcast %84 : f32 to vector<32x128xf32>
    %86 = arith.mulf %1, %85 : vector<32x128xf32>
    %c21 = arith.constant 21 : index
    %87 = memref.load %arg1[%c21] : memref<41xf32, #tpu.memory_space<smem>>
    %88 = vector.broadcast %87 : f32 to vector<32x128xf32>
    %89 = arith.mulf %3, %88 : vector<32x128xf32>
    %90 = arith.addf %86, %89 : vector<32x128xf32>
    %c24 = arith.constant 24 : index
    %91 = memref.load %arg1[%c24] : memref<41xf32, #tpu.memory_space<smem>>
    %92 = vector.broadcast %91 : f32 to vector<32x128xf32>
    %93 = arith.addf %90, %92 : vector<32x128xf32>
    %94 = math.tanh %93 : vector<32x128xf32>
    %c22 = arith.constant 22 : index
    %95 = memref.load %arg1[%c22] : memref<41xf32, #tpu.memory_space<smem>>
    %96 = vector.broadcast %95 : f32 to vector<32x128xf32>
    %97 = arith.mulf %1, %96 : vector<32x128xf32>
    %c23 = arith.constant 23 : index
    %98 = memref.load %arg1[%c23] : memref<41xf32, #tpu.memory_space<smem>>
    %99 = vector.broadcast %98 : f32 to vector<32x128xf32>
    %100 = arith.mulf %3, %99 : vector<32x128xf32>
    %101 = arith.addf %97, %100 : vector<32x128xf32>
    %c25 = arith.constant 25 : index
    %102 = memref.load %arg1[%c25] : memref<41xf32, #tpu.memory_space<smem>>
    %103 = vector.broadcast %102 : f32 to vector<32x128xf32>
    %104 = arith.addf %101, %103 : vector<32x128xf32>
    %105 = math.tanh %104 : vector<32x128xf32>
    %106 = tpu.iota {dimensions = array<i32: 1>} : vector<32x128xi32>
    %c3_i32 = arith.constant 3 : i32
    %107 = vector.broadcast %c3_i32 : i32 to vector<32x128xi32>
    %108 = arith.cmpi sge, %106, %107 : vector<32x128xi32>
    %cst = arith.constant 0.000000e+00 : f32
    %109 = vector.broadcast %cst : f32 to vector<32x128xf32>
    %110 = arith.select %108, %94, %109 : vector<32x128xi1>, vector<32x128xf32>
    %cst_8 = arith.constant dense<0.000000e+00> : vector<32xf32>
    %111 = vector.multi_reduction <add>, %110, %cst_8 [1] : vector<32x128xf32> to vector<32xf32>
    %112 = vector.shape_cast %111 : vector<32xf32> to vector<32x1xf32>
    %cst_9 = arith.constant 8.000000e-03 : f32
    %113 = vector.broadcast %cst_9 : f32 to vector<32x1xf32>
    %114 = arith.mulf %112, %113 : vector<32x1xf32>
    %cst_10 = arith.constant 0.000000e+00 : f32
    %115 = vector.broadcast %cst_10 : f32 to vector<32x128xf32>
    %116 = arith.select %108, %105, %115 : vector<32x128xi1>, vector<32x128xf32>
    %cst_11 = arith.constant dense<0.000000e+00> : vector<32xf32>
    %117 = vector.multi_reduction <add>, %116, %cst_11 [1] : vector<32x128xf32> to vector<32xf32>
    %118 = vector.shape_cast %117 : vector<32xf32> to vector<32x1xf32>
    %cst_12 = arith.constant 8.000000e-03 : f32
    %119 = vector.broadcast %cst_12 : f32 to vector<32x1xf32>
    %120 = arith.mulf %118, %119 : vector<32x1xf32>
    %c26 = arith.constant 26 : index
    %121 = memref.load %arg1[%c26] : memref<41xf32, #tpu.memory_space<smem>>
    %122 = vector.broadcast %121 : f32 to vector<32x1xf32>
    %123 = arith.mulf %122, %114 : vector<32x1xf32>
    %c27 = arith.constant 27 : index
    %124 = memref.load %arg1[%c27] : memref<41xf32, #tpu.memory_space<smem>>
    %125 = vector.broadcast %124 : f32 to vector<32x1xf32>
    %126 = arith.mulf %125, %120 : vector<32x1xf32>
    %127 = arith.addf %123, %126 : vector<32x1xf32>
    %c30 = arith.constant 30 : index
    %128 = memref.load %arg1[%c30] : memref<41xf32, #tpu.memory_space<smem>>
    %129 = vector.broadcast %128 : f32 to vector<32x1xf32>
    %130 = arith.addf %127, %129 : vector<32x1xf32>
    %cst_13 = arith.constant 0.000000e+00 : f32
    %131 = vector.broadcast %cst_13 : f32 to vector<32x1xf32>
    %132 = arith.maximumf %130, %131 : vector<32x1xf32>
    %c28 = arith.constant 28 : index
    %133 = memref.load %arg1[%c28] : memref<41xf32, #tpu.memory_space<smem>>
    %134 = vector.broadcast %133 : f32 to vector<32x1xf32>
    %135 = arith.mulf %134, %114 : vector<32x1xf32>
    %c29 = arith.constant 29 : index
    %136 = memref.load %arg1[%c29] : memref<41xf32, #tpu.memory_space<smem>>
    %137 = vector.broadcast %136 : f32 to vector<32x1xf32>
    %138 = arith.mulf %137, %120 : vector<32x1xf32>
    %139 = arith.addf %135, %138 : vector<32x1xf32>
    %c31 = arith.constant 31 : index
    %140 = memref.load %arg1[%c31] : memref<41xf32, #tpu.memory_space<smem>>
    %141 = vector.broadcast %140 : f32 to vector<32x1xf32>
    %142 = arith.addf %139, %141 : vector<32x1xf32>
    %cst_14 = arith.constant 0.000000e+00 : f32
    %143 = vector.broadcast %cst_14 : f32 to vector<32x1xf32>
    %144 = arith.maximumf %142, %143 : vector<32x1xf32>
    %c32 = arith.constant 32 : index
    %145 = memref.load %arg1[%c32] : memref<41xf32, #tpu.memory_space<smem>>
    %146 = vector.broadcast %145 : f32 to vector<32x1xf32>
    %147 = arith.mulf %146, %132 : vector<32x1xf32>
    %c33 = arith.constant 33 : index
    %148 = memref.load %arg1[%c33] : memref<41xf32, #tpu.memory_space<smem>>
    %149 = vector.broadcast %148 : f32 to vector<32x1xf32>
    %150 = arith.mulf %149, %144 : vector<32x1xf32>
    %151 = arith.addf %147, %150 : vector<32x1xf32>
    %c36 = arith.constant 36 : index
    %152 = memref.load %arg1[%c36] : memref<41xf32, #tpu.memory_space<smem>>
    %153 = vector.broadcast %152 : f32 to vector<32x1xf32>
    %154 = arith.addf %151, %153 : vector<32x1xf32>
    %155 = arith.negf %154 : vector<32x1xf32>
    %156 = math.exp %155 : vector<32x1xf32>
    %cst_15 = arith.constant 1.000000e+00 : f32
    %157 = vector.broadcast %cst_15 : f32 to vector<32x1xf32>
    %158 = arith.addf %157, %156 : vector<32x1xf32>
    %159 = arith.divf %157, %158 : vector<32x1xf32>
    %c34 = arith.constant 34 : index
    %160 = memref.load %arg1[%c34] : memref<41xf32, #tpu.memory_space<smem>>
    %161 = vector.broadcast %160 : f32 to vector<32x1xf32>
    %162 = arith.mulf %161, %132 : vector<32x1xf32>
    %c35 = arith.constant 35 : index
    %163 = memref.load %arg1[%c35] : memref<41xf32, #tpu.memory_space<smem>>
    %164 = vector.broadcast %163 : f32 to vector<32x1xf32>
    %165 = arith.mulf %164, %144 : vector<32x1xf32>
    %166 = arith.addf %162, %165 : vector<32x1xf32>
    %c37 = arith.constant 37 : index
    %167 = memref.load %arg1[%c37] : memref<41xf32, #tpu.memory_space<smem>>
    %168 = vector.broadcast %167 : f32 to vector<32x1xf32>
    %169 = arith.addf %166, %168 : vector<32x1xf32>
    %170 = arith.negf %169 : vector<32x1xf32>
    %171 = math.exp %170 : vector<32x1xf32>
    %cst_16 = arith.constant 1.000000e+00 : f32
    %172 = vector.broadcast %cst_16 : f32 to vector<32x1xf32>
    %173 = arith.addf %172, %171 : vector<32x1xf32>
    %174 = arith.divf %172, %173 : vector<32x1xf32>
    %c3_i32_17 = arith.constant 3 : i32
    %175 = tpu.dynamic_rotate %64 by %c3_i32_17 dim 1 : vector<32x128xf32>, i32 -> vector<32x128xf32>
    %176 = vector.broadcast %159 : vector<32x1xf32> to vector<32x128xf32>
    %177 = arith.mulf %176, %94 : vector<32x128xf32>
    %178 = arith.addf %175, %177 : vector<32x128xf32>
    %c3_i32_18 = arith.constant 3 : i32
    %179 = tpu.dynamic_rotate %83 by %c3_i32_18 dim 1 : vector<32x128xf32>, i32 -> vector<32x128xf32>
    %180 = vector.broadcast %174 : vector<32x1xf32> to vector<32x128xf32>
    %181 = arith.mulf %180, %105 : vector<32x128xf32>
    %182 = arith.addf %179, %181 : vector<32x128xf32>
    %c38 = arith.constant 38 : index
    %183 = memref.load %arg1[%c38] : memref<41xf32, #tpu.memory_space<smem>>
    %184 = vector.broadcast %183 : f32 to vector<32x128xf32>
    %185 = arith.mulf %184, %178 : vector<32x128xf32>
    %c39 = arith.constant 39 : index
    %186 = memref.load %arg1[%c39] : memref<41xf32, #tpu.memory_space<smem>>
    %187 = vector.broadcast %186 : f32 to vector<32x128xf32>
    %188 = arith.mulf %187, %182 : vector<32x128xf32>
    %189 = arith.addf %185, %188 : vector<32x128xf32>
    %c40 = arith.constant 40 : index
    %190 = memref.load %arg1[%c40] : memref<41xf32, #tpu.memory_space<smem>>
    %191 = vector.broadcast %190 : f32 to vector<32x128xf32>
    %192 = arith.addf %189, %191 : vector<32x128xf32>
    %c0_19 = arith.constant 0 : index
    %c0_20 = arith.constant 0 : index
    %193 = vector.load %arg3[%c0_19, %c0_20] : memref<32x128xf32, #tpu.memory_space<vmem>>, vector<32x128xf32>
    tpu.vector_store %arg3[%c0_19, %c0_20], %192 {strides = array<i32>} : memref<32x128xf32, #tpu.memory_space<vmem>>, vector<32x128xf32>,
    return
  }
  func.func @transform_0(%arg0: i32, %arg1: memref<41xf32, #tpu.memory_space<smem>>) -> (i32, i32, i32) {
    %c0_i32 = arith.constant 0 : i32
    %c0_i32_0 = arith.constant 0 : i32
    %c0_i32_1 = arith.constant 0 : i32
    return %c0_i32, %arg0, %c0_i32_0 : i32, i32, i32
  }
  func.func @transform_1(%arg0: i32, %arg1: memref<41xf32, #tpu.memory_space<smem>>) -> (i32, i32) {
    %c0_i32 = arith.constant 0 : i32
    %c0_i32_0 = arith.constant 0 : i32
    return %arg0, %c0_i32 : i32, i32
  }
}

</mosaic_0001>

<bundles_post_ra>
// kernel: tpu_custom_call.1
= control target key start
LH: loop header
LB: loop body
LE: loop exit
PB: predicated region body
PF: predicated region fallthrough
CT: control target
= control target key end

     0   :  { %s1172_s12 = smov [#allocation3]   ;;  %s1786_s0 = inlined_call_operand.hbm [shape: f32[41], index: 0, kind: input, shape index: {}]   ;;  %s1787_s1 = inlined_call_operand.hbm [shape: f32[2,128,128], index: 1, kind: input, shape index: {}]   ;;  %s1788_s2 = inlined_call_operand.hbm [shape: f32[128,128], index: 2, kind: output, shape index: {}]  }
   0x1   :  { %s8_s11 = sshll.u32 %s1786_s0, 4  ;;  %s9_s11 = int_to_ptr.hbm [resolvable:$true] %s8_s11 }
   0x2   :  { %11 = dma.hbm_to_smem %s9_s11, 16, %s1172_s12, [#allocation2] }
   0x3   :  { %1146 = dma.done.wait [#allocation2], 16 }
   0x4   :  { %1147 = vsyncadd [#allocation2], 4294967280 }
   0x5   :  { %14 = sfence }
   0x6   :  { %15 = vsyncpa [#allocation5], 0 }
   0x7   :  { %17 = vsyncpa [#allocation5 + $0x1], 0 }
   0x8   :  { %18 = vsyncpa [#allocation6], 0 }
   0x9   :  { %20 = vsyncpa [#allocation6 + $0x1], 0  ;;  %s1202_s13 = smov 0   ;;  %s1204_s14 = smov 0  }
   0xa   :  { %s1206_s15 = smov 0   ;;  %s1208_s16 = smov 0  }
   0xb LB: > { %s1223_s0 = sadd.s32 4294967295, %s1170_s16   ;;  %s880_s17 = sadd.s32 4294967294, %s1170_s16   ;;  %s1170_s16 = sphi %s1208_s16, %s1812_s16   ;;  %s1166_s15 = sphi %s1206_s15, %s1811_s15   ;;  %s1162_s14 = sphi %s1204_s14, %s1810_s14   ;;  %s1158_s13 = sphi %s1202_s13, %s1809_s13  }
   0xc   : > { %s1227_s18 = sadd.s32 1, %s1170_s16   ;;  %s33_s19 = sadd.s32 1, %s1166_s15 }
   0xd   : > { %s30_s20 = ssub.s32 %s1170_s16, %s1227_s18  ;;  %p40_p0 = scmp.ne.s32.totalorder %s1166_s15, %s1162_s14 }
   0xe   : > { %p31_p1 = scmp.eq.s32.totalorder %s30_s20, 0  ;;  %p41_p2 = scmp.eq.s32.totalorder %s1170_s16, 0 }
   0xf   : > { %p46_p3 = scmp.ne.s32.totalorder %s1162_s14, %s1158_s13  ;;  %p47_p4 = scmp.eq.s32.totalorder %s1223_s0, 0 }
  0x10   : > { %s1239_s21 = scalar_select %p31_p1, %s1166_s15, %s33_s19  }
  0x11   : > { %p1241_p5 = por %p41_p2, %p40_p0  ;;  %p1245_p6 = por %p47_p4, %p46_p3 }
  0x12   : > { %p70_p7 = scmp.eq.s32.totalorder %s1223_s0, 3  ;;  %p76_p8 = scmp.eq.s32.totalorder %s880_s17, 3 }
  0x13   : > { %p882_p11 = scmp.ge.s32.totalorder %s1170_s16, 4 }
  0x14   : > { %p1250_p9 = por %p70_p7, %p40_p0  ;;  %p1254_p10 = por %p76_p8, %p46_p3 }
  0x15   : > { %92 = sbr.rel (%p882_p11) target bundleno = 40 (0x28), region = 16 }
  0x1a   : > { %s96_s26 = sand.u32 1, %s1166_s15   ;;  %s948_s27 = sshll.u32 %s1170_s16, 5 }
  0x1b   : > { %s883_s28 = sshll.u32 %s96_s26, 6  ;;  %s105_s3 = scalar_lea.hbm %s1787_s1, %s948_s27 }
  0x1c   : > { %s950_s4 = scalar_select %p1241_p5, [#allocation0], [#allocation10] }
  0x1d   : > { %s118_s5 = sshll.u32 %s105_s3, 4  ;;  %s100_s6 = scalar_lea.vmem [#allocation4], %s883_s28  ;;  %s119_s5 = int_to_ptr.hbm [resolvable:$true] %s118_s5 }
  0x1e   : > { %s120_s7 = sshll.u32 %s100_s6, 4  ;;  %s110_s8 = sld [smem:[%s950_s4]]   ;;  %s121_s7 = int_to_ptr.vmem [resolvable:$true] %s120_s7 }
  0x1f   : > { %s1173_s9 = smov 2048   ;;  %s1174_s10 = smov 512  }
  0x20   : > { %951 = sst [smem:[#allocation9]] (%p1241_p5), %s1173_s9  ;;  %s1175_s11 = smov 4  }
  0x21   : > { %952 = sst [smem:[#allocation9 + $0x1]] (%p1241_p5), %s1174_s10  ;;  %s1176_s12 = smov 128  }
  0x22   : > { %953 = sst [smem:[#allocation9 + $0x2]] (%p1241_p5), %s1175_s11  ;;  %s1177_s20 = smov 8  }
  0x23   : > { %954 = sst [smem:[#allocation9 + $0x3]] (%p1241_p5), %s1176_s12  ;;  %s97_s27 = scalar_lea.sflag [#allocation5], %s96_s26 }
  0x24   : > { %s886_s17 = sshll.u32 %s110_s8, 26  ;;  %955 = sst [smem:[#allocation9 + $0x4]] (%p1241_p5), %s1176_s12 }
  0x25   : > { %s887_s19 = sadd.s32 134217728, %s886_s17  ;;  %956 = sst [smem:[#allocation9 + $0x5]] (%p1241_p5), %s1177_s20 }
  0x26   : > { %s1178_s28 = smov [#allocation8]  }
  0x27   : > { %957 = dma.general (%p1241_p5), %s119_s5, 1024, %s121_s7, %s97_s27, %s1178_s28, [#allocation9], %s887_s19, 0  }
  0x28 PF: > { %p888_p12 = scmp.ge.s32.totalorder %s1170_s16, 1  ;;  %p141_p13 = scmp.lt.s32.totalorder %s1170_s16, 5 }
  0x2a   : > { %p142_p0 = pnand %p888_p12, %p141_p13 }
  0x2b   : > { %s1283_s29 = sand.u32 (!%p142_p0), 1, %s1162_s14  }
  0x2c   : > { %145 = sbr.rel (%p142_p0) target bundleno = 475 (0x1db), region = 24  ;;  %s889_s30 = sshll.u32 (!%p142_p0), %s1283_s29, 6 }
  0x2d   : > { %s148_s3 = scalar_lea.sflag (!%p142_p0), [#allocation5], %s1283_s29  ;;  %s151_s4 = scalar_lea.vmem (!%p142_p0), [#allocation4], %s889_s30 }
  0x31   : > { %1149 = dma.done.wait (%p1245_p6), %s148_s3, 1024  }
  0x32   : > { %1151 = vsyncadd (%p1245_p6), %s148_s3, 4294966272  ;;  %v1291_v0 = vld [vmem:[%s151_s4 + $0x10] sm:$0xff]  ;;  %v1293_v1 = vld [vmem:[%s151_s4] sm:$0xff]  ;;  %s1179_s22 = smov 127   ;;  %s914_s23 = sld [smem:[#allocation3 + $0x14]]  ;;  %v450_v19 = vlaneseq }
  0x33   : > { %186 = vrot.lane.b32.xlu1 %v1291_v0, %s1179_s22  ;;  %182 = vrot.lane.b32.xlu0 %v1293_v1, %s1179_s22  ;;  %v1297_v2 = vld [vmem:[%s151_s4 + $0x20] sm:$0xff]  ;;  %v1300_v3 = vld [vmem:[%s151_s4 + $0x18] sm:$0xff]  ;;  %s915_s26 = sld [smem:[#allocation3 + $0x15]]  ;;  %s1180_s3 = smov 126  }
  0x34   : > { %190 = vrot.lane.b32.xlu2 %v1297_v2, %s1179_s22  ;;  %v1302_v4 = vld [vmem:[%s151_s4 + $0x8] sm:$0xff]  ;;  %v1309_v6 = vld [vmem:[%s151_s4 + $0x38] sm:$0xff]  ;;  %v1311_v7 = vld [vmem:[%s151_s4 + $0x30] sm:$0xff]  ;;  %s916_s5 = sld [smem:[#allocation3 + $0x18]]  ;;  %v1325_v24 = vand.u32 127, %v450_v19 }
  0x35   : > { %v1304_v5 = vld [vmem:[%s151_s4 + $0x28] sm:$0xff]  ;;  %s917_s6 = sld [smem:[#allocation3 + $0x16]] }
  0x36   : > { %s918_s7 = sld [smem:[#allocation3 + $0x17]]  ;;  %vm452_vm0 = vcmp.ge.s32.totalorder %v1325_v24, 3 }
  0x37   : > { %s919_s8 = sld [smem:[#allocation3 + $0x19]] }
  0x38   : > { %v399_v8 = vstv %s914_s23  ;;  %s198_s9 = sld [smem:[#allocation3]] }
  0x39   : > { %v405_v9 = vstv %s915_s26  ;;  %v401_v10 = vmul.f32 %v399_v8, %v1302_v4  ;;  %v400_v14 = vmul.f32 %v399_v8, %v1293_v1  ;;  %v403_v17 = vmul.f32 %v399_v8, %v1300_v3  ;;  %s895_s10 = sld [smem:[#allocation3 + $0x1]] }
  0x3a   : > { %v407_v11 = vmul.f32 %v1304_v5, %v405_v9  ;;  %v415_v13 = vstv %s916_s5  ;;  %v406_v15 = vmul.f32 %v1297_v2, %v405_v9  ;;  %v409_v18 = vmul.f32 %v1309_v6, %v405_v9  ;;  %s896_s11 = sld [smem:[#allocation3 + $0x2]] }
  0x3b   : > { %188 = vrot.lane.b32.xlu1 %v1300_v3, %s1179_s22  ;;  %184 = vrot.lane.b32.xlu0 %v1302_v4, %s1179_s22  ;;  %v1321_v21 = vstv %s917_s6  ;;  %v402_v40 = vmul.f32 %v399_v8, %v1291_v0  ;;  %v408_v41 = vmul.f32 %v1311_v7, %v405_v9  ;;  %s897_s12 = sld [smem:[#allocation3 + $0x3]] }
  0x3c   : > { %192 = vrot.lane.b32.xlu2 %v1304_v5, %s1179_s22  ;;  %v411_v12 = vadd.f32 %v407_v11, %v401_v10  ;;  %v410_v20 = vadd.f32 %v406_v15, %v400_v14  ;;  %v1323_v22 = vstv %s918_s7  ;;  %v413_v23 = vadd.f32 %v409_v18, %v403_v17  ;;  %s899_s17 = sld [smem:[#allocation3 + $0x4]] }
  0x3d   : > { %v426_v26 = vmul.f32 %v1321_v21, %v1293_v1  ;;  %v432_v27 = vmul.f32 %v1297_v2, %v1323_v22  ;;  %v1334_v31 = vstv %s919_s8  ;;  %v412_v42 = vadd.f32 %v408_v41, %v402_v40  ;;  %s900_s19 = sld [smem:[#allocation3 + $0x5]] }
  0x3e   : > { %v417_v16 = vadd.f32 %v415_v13, %v411_v12  ;;  %v416_v25 = vadd.f32 %v415_v13, %v410_v20  ;;  %v419_v28 = vadd.f32 %v415_v13, %v413_v23  ;;  %v199_v46 = vstv %s198_s9  ;;  %s898_s20 = sld [smem:[#allocation3 + $0x8]] }
  0x3f   : > { %v436_v30 = vadd.f32 %v432_v27, %v426_v26  ;;  %v418_v43 = vadd.f32 %v415_v13, %v412_v42  ;;  %v205_v47 = vstv %s895_s10  ;;  %v200_v49 = vmul.f32 %v199_v46, %v1293_v1  ;;  %s901_s27 = sld [smem:[#allocation3 + $0x6]] }
  0x40   : > { %1010 = vtanh.f32 %v417_v16  ;;  %v215_v48 = vstv %s896_s11  ;;  %s902_s28 = sld [smem:[#allocation3 + $0x7]]  ;;  %v202_v62 = vmul.f32 %v199_v46, %v1291_v0  ;;  %v203_v9 = vmul.f32 %v199_v46, %v1300_v3  ;;  %s1181_s11 = smov 3  }
  0x41   : > { %1012 = vtanh.f32 %v416_v25  ;;  %v442_v33 = vadd.f32 %v1334_v31, %v436_v30  ;;  %v225_v53 = vstv %s897_s12  ;;  %v216_v55 = vmul.f32 %v1297_v2, %v215_v48  ;;  %s1375_s30 = sld [smem:[#allocation3 + $0x9]] }
  0x42   : > { %1014 = vtanh.f32 %v419_v28  ;;  %v245_v58 = vstv %s899_s17  ;;  %v201_v13 = vmul.f32 %v199_v46, %v1302_v4  ;;  %v217_v23 = vmul.f32 %v1304_v5, %v215_v48  ;;  %s904_s4 = sld [smem:[#allocation3 + $0xa]] }
  0x43   : > { %196 = vrot.lane.b32.xlu1 %v1309_v6, %s1179_s22  ;;  %194 = vrot.lane.b32.xlu0 %v1311_v7, %s1179_s22  ;;  %1016 = vtanh.f32 %v442_v33  ;;  %v251_v59 = vstv %s900_s19  ;;  %v246_v10 = vmul.f32 %v245_v58, %v1293_v1  ;;  %v248_v15 = vmul.f32 %v245_v58, %v1291_v0  ;;  %s909_s22 = sld [smem:[#allocation3 + $0xe]] }
  0x44   : > { %1018 = vtanh.f32 %v418_v43  ;;  %v1364_v61 = vstv %s898_s20  ;;  %v219_v25 = vmul.f32 %v1309_v6, %v215_v48  ;;  %v218_v26 = vmul.f32 %v1311_v7, %v215_v48  ;;  %s905_s23 = sld [smem:[#allocation3 + $0xb]] }
  0x45   : > { %v261_v16 = vstv %s901_s27  ;;  %v249_v41 = vmul.f32 %v245_v58, %v1300_v3  ;;  %s910_s26 = sld [smem:[#allocation3 + $0xf]] }
  0x46   : > { %v1331_v29 = vpop.eup %1010  ;;  %v264_v48 = vmul.f32 %v1311_v7, %v261_v16  ;;  %s906_s5 = sld [smem:[#allocation3 + $0xc]] }
  0x47   : > { %v454_v32 = vsel %vm452_vm0, %v1331_v29, 0.0  ;;  %v1340_v34 = vpop.eup %1012  ;;  %s911_s6 = sld [smem:[#allocation3 + $0x10]] }
  0x48   : > { %v1342_v35 = vpop.eup %1014  ;;  %v453_v36 = vsel %vm452_vm0, %v1340_v34, 0.0  ;;  %s907_s7 = sld [smem:[#allocation3 + $0xd]] }
  0x49   : > { %v456_v37 = vsel %vm452_vm0, %v1342_v35, 0.0  ;;  %v1350_v38 = vpop.eup %1016  ;;  %s912_s8 = sld [smem:[#allocation3 + $0x11]] }
  0x4a   : > { %v469_v39 = vsel %vm452_vm0, %v1350_v38, 0.0  ;;  %v1357_v44 = vpop.eup %1018  ;;  %s908_s9 = sld [smem:[#allocation3 + $0x12]] }
  0x4b   : > { %v455_v45 = vsel %vm452_vm0, %v1357_v44, 0.0  ;;  %s913_s10 = sld [smem:[#allocation3 + $0x13]] }
  0x4c   : > { %s920_s12 = sld [smem:[#allocation3 + $0x1a]] }
  0x4d   : > { %s923_s17 = sld [smem:[#allocation3 + $0x1c]] }
  0x4e   : > { %s921_s19 = sld [smem:[#allocation3 + $0x1b]] }
  0x4f   : > { %s924_s20 = sld [smem:[#allocation3 + $0x1d]] }
  0x50   : > { %s922_s27 = sld [smem:[#allocation3 + $0x1e]] }
  0x65   : > { %459 = vadd.xlane.f32.xlu2 %v454_v32  ;;  %v262_v32 = vmul.f32 %v1297_v2, %v261_v16 }
  0x6d   : > { %457 = vadd.xlane.f32.xlu1 %v453_v36  ;;  %463 = vadd.xlane.f32.xlu2 %v456_v37  ;;  %v271_v37 = vstv %s902_s28  ;;  %s925_s28 = sld [smem:[#allocation3 + $0x1f]] }
  0x6e   : > { %461 = vadd.xlane.f32.xlu0 %v455_v45 }
  0x75   : > { %473 = vadd.xlane.f32.xlu1 %v469_v39  ;;  %v247_v39 = vmul.f32 %v245_v58, %v1302_v4 }
  0x8e   : > { %v191_v50 = vpop.permute.xlu2 %190 }
  0x8f   : > { %v226_v57 = vmul.f32 %v225_v53, %v191_v50 }
  0x96   : > { %v193_v19 = vpop.permute.xlu2 %192 }
  0x97   : > { %v227_v36 = vmul.f32 %v225_v53, %v193_v19 }
  0xa5   : > { %v187_v51 = vpop.permute.xlu1 %186  ;;  %v183_v52 = vpop.permute.xlu0 %182 }
  0xa6   : > { %v206_v54 = vmul.f32 %v205_v47, %v183_v52  ;;  %v208_v63 = vmul.f32 %v205_v47, %v187_v51  ;;  %v252_v11 = vmul.f32 %v251_v59, %v183_v52  ;;  %v254_v27 = vmul.f32 %v251_v59, %v187_v51 }
  0xa7   : > { %v272_v51 = vmul.f32 %v271_v37, %v191_v50 }
  0xa8   : > { %v210_v56 = vadd.f32 %v206_v54, %v200_v49  ;;  %v212_v1 = vadd.f32 %v208_v63, %v202_v62  ;;  %v256_v30 = vadd.f32 %v252_v11, %v246_v10  ;;  %v258_v45 = vadd.f32 %v254_v27, %v248_v15 }
  0xa9   : > { %v265_v63 = vmul.f32 %v1309_v6, %v261_v16  ;;  %v281_v11 = vstv %s1375_s30  ;;  %s926_s30 = sld [smem:[#allocation3 + $0x20]] }
  0xaa   : > { %v220_v60 = vadd.f32 %v216_v55, %v210_v56  ;;  %v266_v49 = vadd.f32 %v262_v32, %v256_v30 }
  0xac   : > { %v230_v8 = vadd.f32 %v226_v57, %v220_v60  ;;  %v263_v57 = vmul.f32 %v1304_v5, %v261_v16 }
  0xad   : > { %v189_v12 = vpop.permute.xlu1 %188  ;;  %v185_v14 = vpop.permute.xlu0 %184 }
  0xae   : > { %v236_v17 = vadd.f32 %v1364_v61, %v230_v8  ;;  %v209_v18 = vmul.f32 %v205_v47, %v189_v12  ;;  %v207_v20 = vmul.f32 %v205_v47, %v185_v14  ;;  %v253_v40 = vmul.f32 %v251_v59, %v185_v14 }
  0xaf   : > { %v255_v42 = vmul.f32 %v251_v59, %v189_v12  ;;  %v222_v47 = vadd.f32 %v218_v26, %v212_v1  ;;  %v268_v8 = vadd.f32 %v264_v48, %v258_v45  ;;  %v276_v12 = vadd.f32 %v272_v51, %v266_v49 }
  0xb0   : > { %1020 = vtanh.f32 %v236_v17  ;;  %v213_v28 = vadd.f32 %v209_v18, %v203_v9  ;;  %v211_v33 = vadd.f32 %v207_v20, %v201_v13  ;;  %v257_v56 = vadd.f32 %v253_v40, %v247_v39 }
  0xb1   : > { %v259_v59 = vadd.f32 %v255_v42, %v249_v41  ;;  %v273_v14 = vmul.f32 %v271_v37, %v193_v19  ;;  %v282_v20 = vadd.f32 %v281_v11, %v276_v12  ;;  %v433_v39 = vmul.f32 %v1304_v5, %v1323_v22 }
  0xb2   : > { %v221_v43 = vadd.f32 %v217_v23, %v211_v33  ;;  %v223_v46 = vadd.f32 %v219_v25, %v213_v28  ;;  %v267_v13 = vadd.f32 %v263_v57, %v257_v56  ;;  %v429_v40 = vmul.f32 %v1321_v21, %v1300_v3 }
  0xb3   : > { %v269_v17 = vadd.f32 %v265_v63, %v259_v59  ;;  %v435_v41 = vmul.f32 %v1309_v6, %v1323_v22  ;;  %v434_v45 = vmul.f32 %v1311_v7, %v1323_v22  ;;  %v307_v51 = vstv %s904_s4  ;;  %s933_s4 = sld [smem:[#allocation3 + $0x22]] }
  0xb4   : > { %v231_v52 = vadd.f32 %v227_v36, %v221_v43  ;;  %v277_v23 = vadd.f32 %v273_v14, %v267_v13  ;;  %v428_v43 = vmul.f32 %v1321_v21, %v1291_v0  ;;  %v323_v57 = vstv %s906_s5  ;;  %s940_s5 = sld [smem:[#allocation3 + $0x26]] }
  0xb5   : > { %v197_v54 = vpop.permute.xlu1 %196  ;;  %v195_v2 = vpop.permute.xlu0 %194 }
  0xb6   : > { %v1381_v55 = vpop.eup %1020  ;;  %v229_v60 = vmul.f32 %v225_v53, %v197_v54  ;;  %v228_v58 = vmul.f32 %v225_v53, %v195_v2  ;;  %v237_v62 = vadd.f32 %v1364_v61, %v231_v52  ;;  %v274_v10 = vmul.f32 %v271_v37, %v195_v2 }
  0xb7   : > { %290 = vrot.lane.b32.xlu2 %v1381_v55, %s1180_s3  ;;  %v275_v18 = vmul.f32 %v271_v37, %v197_v54  ;;  %v283_v27 = vadd.f32 %v281_v11, %v277_v23  ;;  %v427_v37 = vmul.f32 %v1321_v21, %v1302_v4  ;;  %v438_v4 = vadd.f32 %v434_v45, %v428_v43 }
  0xb8   : > { %v233_v50 = vadd.f32 %v229_v60, %v223_v46  ;;  %v232_v9 = vadd.f32 %v228_v58, %v222_v47  ;;  %1022 = vtanh.f32 %v237_v62  ;;  %v278_v16 = vadd.f32 %v274_v10, %v268_v8 }
  0xb9   : > { %v279_v26 = vadd.f32 %v275_v18, %v269_v17  ;;  %v437_v42 = vadd.f32 %v433_v39, %v427_v37  ;;  %v439_v46 = vadd.f32 %v435_v41, %v429_v40  ;;  %v444_v5 = vadd.f32 %v1334_v31, %v438_v4 }
  0xba   : > { %v239_v53 = vadd.f32 %v1364_v61, %v233_v50  ;;  %v238_v15 = vadd.f32 %v1364_v61, %v232_v9  ;;  %v284_v1 = vadd.f32 %v281_v11, %v278_v16  ;;  %v313_v52 = vstv %s905_s23  ;;  %s928_s23 = sld [smem:[#allocation3 + $0x24]] }
  0xbb   : > { %v285_v28 = vadd.f32 %v281_v11, %v279_v26  ;;  %v443_v47 = vadd.f32 %v1334_v31, %v437_v42  ;;  %v445_v48 = vadd.f32 %v1334_v31, %v439_v46  ;;  %v353_v54 = vstv %s909_s22  ;;  %s934_s22 = sld [smem:[#allocation3 + $0x23]] }
  0xbc   : > { %1024 = vtanh.f32 %v239_v53  ;;  %v359_v2 = vstv %s910_s26  ;;  %v369_v60 = vstv %s911_s6  ;;  %v308_v24 = vmul.f32 %v1381_v55, %v307_v51  ;;  %s935_s26 = sld [smem:[#allocation3 + $0x25]] }
  0xbd   : > { %1026 = vtanh.f32 %v238_v15  ;;  %v354_v59 = vmul.f32 %v1381_v55, %v353_v54  ;;  %s941_s6 = sld [smem:[#allocation3 + $0x27]] }
  0xbe   : > { %v1391_v25 = vpop.eup %1022  ;;  %1028 = vtanh.f32 %v282_v20 }
  0xbf   : > { %292 = vrot.lane.b32.xlu0 %v1391_v25, %s1180_s3  ;;  %1030 = vtanh.f32 %v284_v1 }
  0xc0   : > { %1032 = vtanh.f32 %v283_v27 }
  0xc1   : > { %1034 = vtanh.f32 %v285_v28 }
  0xc2   : > { %v1395_v19 = vpop.eup %1024  ;;  %1036 = vtanh.f32 %v443_v47 }
  0xc3   : > { %296 = vrot.lane.b32.xlu2 %v1395_v19, %s1180_s3  ;;  %v1399_v61 = vpop.eup %1026  ;;  %1038 = vtanh.f32 %v445_v48  ;;  %v311_v13 = vmul.f32 %v1395_v19, %v307_v51  ;;  %v357_v14 = vmul.f32 %v1395_v19, %v353_v54  ;;  %v309_v19 = vmul.f32 %v1391_v25, %v307_v51 }
  0xc4   : > { %294 = vrot.lane.b32.xlu1 %v1399_v61, %s1180_s3  ;;  %v1029_v30 = vpop.eup %1028  ;;  %1040 = vtanh.f32 %v444_v5  ;;  %v310_v47 = vmul.f32 %v1399_v61, %v307_v51  ;;  %v356_v4 = vmul.f32 %v1399_v61, %v353_v54 }
  0xc5   : > { %v1404_v32 = vpop.eup %1030  ;;  %v324_v8 = vmul.f32 %v1029_v30, %v323_v57  ;;  %v370_v9 = vmul.f32 %v1029_v30, %v369_v60 }
  0xc6   : > { %v1408_v33 = vpop.eup %1032 }
  0xc7   : > { %298 = vrot.lane.b32.xlu0 %v1029_v30, %s1180_s3  ;;  %v1035_v36 = vpop.eup %1034  ;;  %v355_v30 = vmul.f32 %v1391_v25, %v353_v54  ;;  %v325_v41 = vmul.f32 %v1408_v33, %v323_v57  ;;  %v371_v42 = vmul.f32 %v1408_v33, %v369_v60 }
  0xc8   : > { %v1428_v3 = vpop.eup %1036  ;;  %v327_v16 = vmul.f32 %v1035_v36, %v323_v57  ;;  %v373_v20 = vmul.f32 %v1035_v36, %v369_v60 }
  0xc9   : > { %v1430_v6 = vpop.eup %1038  ;;  %v470_v0 = vsel %vm452_vm0, %v1428_v3, 0.0 }
  0xca   : > { %v1435_v7 = vpop.eup %1040  ;;  %v472_v21 = vsel %vm452_vm0, %v1430_v6, 0.0 }
  0xcb   : > { %302 = vrot.lane.b32.xlu2 %v1404_v32, %s1180_s3  ;;  %v471_v22 = vsel %vm452_vm0, %v1435_v7, 0.0 }
  0xcc   : > { %300 = vrot.lane.b32.xlu1 %v1408_v33, %s1180_s3  ;;  %v379_v33 = vstv %s912_s8  ;;  %s890_s8 = sshll.u32 %s1283_s29, 5 }
  0xcf   : > { %304 = vrot.lane.b32.xlu0 %v1035_v36, %s1180_s3  ;;  %s927_s3 = sld [smem:[#allocation3 + $0x21]] }
  0xd8   : > { %v1443_v31 = vpop.xlane.xlu2 %459 }
  0xe0   : > { %v1445_v49 = vpop.xlane.xlu2 %463  ;;  %v1453_v26 = vpop.xlane.xlu1 %457 }
  0xe1   : > { %v1455_v1 = vpop.xlane.xlu0 %461 }
  0xe8   : > { %v1457_v27 = vpop.xlane.xlu1 %473 }
  0xf4   : > { %475 = vadd.xlane.f32.xlu2 %v470_v0  ;;  %v333_v0 = vstv %s907_s7  ;;  %s942_s7 = sld [smem:[#allocation3 + $0x28]] }
  0xf6   : > { %479 = vadd.xlane.f32.xlu1 %v472_v21  ;;  %v326_v21 = vmul.f32 %v1404_v32, %v323_v57 }
  0xf9   : > { %477 = vadd.xlane.f32.xlu0 %v471_v22  ;;  %v372_v22 = vmul.f32 %v1404_v32, %v369_v60  ;;  %v389_v60 = vstv %s913_s10  ;;  %s949_s10 = sshll.u32 %s1223_s0, 5 }
 0x111   : > { %v291_v56 = vpop.permute.xlu2 %290 }
 0x112   : > { %v314_v58 = vmul.f32 %v313_v52, %v291_v56  ;;  %v360_v62 = vmul.f32 %v359_v2, %v291_v56 }
 0x114   : > { %v318_v63 = vadd.f32 %v314_v58, %v308_v24  ;;  %v364_v50 = vadd.f32 %v360_v62, %v354_v59 }
 0x116   : > { %v328_v10 = vadd.f32 %v324_v8, %v318_v63  ;;  %v374_v11 = vadd.f32 %v370_v9, %v364_v50  ;;  %v343_v63 = vstv %s908_s9  ;;  %s1642_s9 = scalar_lea.vmem [#allocation7], %s890_s8 }
 0x11d   : > { %v297_v12 = vpop.permute.xlu2 %296 }
 0x11e   : > { %v317_v53 = vmul.f32 %v313_v52, %v297_v12  ;;  %v363_v15 = vmul.f32 %v359_v2, %v297_v12 }
 0x120   : > { %v321_v17 = vadd.f32 %v317_v53, %v311_v13  ;;  %v367_v18 = vadd.f32 %v363_v15, %v357_v14 }
 0x122   : > { %v331_v23 = vadd.f32 %v327_v16, %v321_v17  ;;  %v1451_v55 = vadd.f32 %v373_v20, %v367_v18 }
 0x125   : > { %v303_v25 = vpop.permute.xlu2 %302 }
 0x126   : > { %v336_v62 = vmul.f32 %v333_v0, %v303_v25 }
 0x131   : > { %v293_v28 = vpop.permute.xlu0 %292 }
 0x132   : > { %v315_v37 = vmul.f32 %v313_v52, %v293_v28  ;;  %v361_v39 = vmul.f32 %v359_v2, %v293_v28 }
 0x134   : > { %v319_v36 = vadd.f32 %v315_v37, %v309_v19  ;;  %v365_v40 = vadd.f32 %v361_v39, %v355_v30  ;;  %v382_v39 = vmul.f32 %v379_v33, %v303_v25 }
 0x136   : > { %v295_v43 = vpop.permute.xlu1 %294  ;;  %v329_v45 = vadd.f32 %v325_v41, %v319_v36  ;;  %v375_v46 = vadd.f32 %v371_v42, %v365_v40 }
 0x137   : > { %v316_v48 = vmul.f32 %v313_v52, %v295_v43  ;;  %v362_v5 = vmul.f32 %v359_v2, %v295_v43  ;;  %v1473_v43 = vstv %s920_s12 }
 0x139   : > { %v320_v56 = vadd.f32 %v316_v48, %v310_v47  ;;  %v366_v24 = vadd.f32 %v362_v5, %v356_v4  ;;  %v299_v58 = vpop.permute.xlu0 %298  ;;  %v1478_v47 = vstv %s923_s17  ;;  %v1480_v4 = vstv %s921_s19  ;;  %s803_s17 = scalar_lea.hbm %s1788_s2, %s949_s10  ;;  %s804_s19 = sshll.u32 %s1642_s9, 4  ;;  %s805_s19 = int_to_ptr.vmem [resolvable:$true] %s804_s19 }
 0x13a   : > { %v334_v59 = vmul.f32 %v333_v0, %v299_v58  ;;  %v380_v61 = vmul.f32 %v379_v33, %v299_v58  ;;  %v1482_v48 = vstv %s924_s20  ;;  %v1492_v58 = vstv %s925_s28  ;;  %s806_s0 = sshll.u32 %s803_s17, 4  ;;  %s792_s20 = scalar_lea.sflag [#allocation6], %s1283_s29  ;;  %s807_s0 = int_to_ptr.hbm [resolvable:$true] %s806_s0 }
 0x13b   : > { %v330_v50 = vadd.f32 %v326_v21, %v320_v56  ;;  %v376_v51 = vadd.f32 %v372_v22, %v366_v24  ;;  %v1490_v24 = vstv %s922_s27  ;;  %s1116_s27 = sshra.s32 %s807_s0, 4  ;;  %s1117_s27 = int_to_ptr.hbm [resolvable:$true] %s1116_s27 }
 0x13c   : > { %v338_v8 = vadd.f32 %v334_v59, %v328_v10  ;;  %v384_v32 = vadd.f32 %v380_v61, %v374_v11  ;;  %s1118_s28 = scalar_lea.hbm %s1117_s27, 32  ;;  %p1123_p4 = scmp.lt.s32.totalorder %s1117_s27, %s1788_s2 }
 0x13d   : > { %v340_v52 = vadd.f32 %v336_v62, %v330_v50  ;;  %v1496_v50 = vstv %s926_s30  ;;  %p1119_p1 = scmp.ne.s32.totalorder %s1117_s27, %s1118_s28 }
 0x13e   : > { %v344_v54 = vadd.f32 %v343_v63, %v338_v8  ;;  %v301_v2 = vpop.permute.xlu1 %300  ;;  %v390_v18 = vadd.f32 %v389_v60, %v384_v32  ;;  %v1508_v32 = vstv %s928_s23 }
 0x13f   : > { %v346_v9 = vadd.f32 %v343_v63, %v340_v52  ;;  %v335_v12 = vmul.f32 %v333_v0, %v301_v2  ;;  %v381_v57 = vmul.f32 %v379_v33, %v301_v2  ;;  %v1502_v52 = vstv %s933_s4  ;;  %p1120_p2 = pnand %p1119_p1, %p1250_p9  ;;  %s1122_s4 = scalar_lea.hbm %s1788_s2, 128 }
 0x140   : > { %1042 = vtanh.f32 %v344_v54  ;;  %v1504_v54 = vstv %s934_s22  ;;  %p1124_p5 = scmp.lt.s32.totalorder %s1122_s4, %s1118_s28 }
 0x141   : > { %1044 = vtanh.f32 %v346_v9  ;;  %v339_v13 = vadd.f32 %v335_v12, %v329_v45  ;;  %v385_v14 = vadd.f32 %v381_v57, %v375_v46  ;;  %v305_v53 = vpop.permute.xlu0 %304  ;;  %v465_v45 = vmul.f32 0.008, %v1453_v26  ;;  %p1121_p3 = pneg %p1120_p2 }
 0x142   : > { %v337_v15 = vmul.f32 %v333_v0, %v305_v53  ;;  %v383_v16 = vmul.f32 %v379_v33, %v305_v53  ;;  %v481_v46 = vmul.f32 0.008, %v1457_v27  ;;  %p1125_p6 = por %p1124_p5, %p1123_p4 }
 0x143   : > { %v345_v17 = vadd.f32 %v343_v63, %v339_v13  ;;  %v391_v10 = vadd.f32 %v389_v60, %v385_v14  ;;  %v487_v0 = vmul.f32 %v1473_v43, %v465_v45  ;;  %v513_v26 = vmul.f32 %v1478_v47, %v465_v45 }
 0x144   : > { %v341_v20 = vadd.f32 %v337_v15, %v331_v23  ;;  %v387_v11 = vadd.f32 %v383_v16, %v1451_v55  ;;  %v386_v23 = vadd.f32 %v382_v39, %v376_v51  ;;  %v493_v25 = vmul.f32 %v1480_v4, %v481_v46  ;;  %p1126_p7 = pnand %p1125_p6, %p1121_p3 }
 0x145   : > { %1046 = vtanh.f32 %v345_v17  ;;  %v519_v27 = vmul.f32 %v1482_v48, %v481_v46  ;;  %v1498_v51 = vstv %s927_s3  ;;  %v466_v13 = vmul.f32 0.008, %v1443_v31 }
 0x146   : > { %v1043_v28 = vpop.eup %1042  ;;  %1048 = vtanh.f32 %v390_v18  ;;  %v347_v30 = vadd.f32 %v343_v63, %v341_v20  ;;  %v393_v36 = vadd.f32 %v389_v60, %v387_v11  ;;  %v392_v55 = vadd.f32 %v389_v60, %v386_v23 }
 0x147   : > { %v1045_v19 = vpop.eup %1044  ;;  %733 = vrot.lane.b32.xlu2 %v1043_v28, %s1181_s11  ;;  %1050 = vtanh.f32 %v391_v10  ;;  %v497_v22 = vadd.f32 %v493_v25, %v487_v0  ;;  %v523_v56 = vadd.f32 %v519_v27, %v513_v26  ;;  %v1512_v17 = vstv %s935_s26 }
 0x148   : > { %737 = vrot.lane.b32.xlu1 %v1045_v19, %s1181_s11  ;;  %1052 = vtanh.f32 %v347_v30  ;;  %v488_v20 = vmul.f32 %v1473_v43, %v466_v13  ;;  %v514_v28 = vmul.f32 %v1478_v47, %v466_v13  ;;  %v468_v31 = vmul.f32 0.008, %v1445_v49 }
 0x149   : > { %1054 = vtanh.f32 %v393_v36  ;;  %v503_v33 = vadd.f32 %v1490_v24, %v497_v22  ;;  %v529_v59 = vadd.f32 %v1492_v58, %v523_v56  ;;  %v467_v0 = vmul.f32 0.008, %v1455_v1 }
 0x14a   : > { %1056 = vtanh.f32 %v392_v55  ;;  %v516_v55 = vmul.f32 %v1478_v47, %v468_v31 }
 0x14b   : > { %v1047_v37 = vpop.eup %1046  ;;  %v507_v62 = vmax.f32 %v503_v33, 0.0  ;;  %v533_v63 = vmax.f32 %v529_v59, 0.0 }
 0x14c   : > { %735 = vrot.lane.b32.xlu0 %v1047_v37, %s1181_s11  ;;  %v1049_v40 = vpop.eup %1048 }
 0x14d   : > { %v1051_v41 = vpop.eup %1050  ;;  %v539_v8 = vmul.f32 %v1496_v50, %v507_v62  ;;  %v545_v61 = vmul.f32 %v1498_v51, %v533_v63  ;;  %v637_v12 = vmul.f32 %v1502_v52, %v507_v62  ;;  %v643_v57 = vmul.f32 %v1504_v54, %v533_v63 }
 0x14e   : > { %v1053_v42 = vpop.eup %1052  ;;  %v489_v62 = vmul.f32 %v1473_v43, %v467_v0  ;;  %v515_v63 = vmul.f32 %v1478_v47, %v467_v0 }
 0x14f   : > { %749 = vrot.lane.b32.xlu2 %v1049_v40, %s1181_s11  ;;  %v1055_v5 = vpop.eup %1054  ;;  %v549_v9 = vadd.f32 %v545_v61, %v539_v8  ;;  %v647_v53 = vadd.f32 %v643_v57, %v637_v12 }
 0x150   : > { %751 = vrot.lane.b32.xlu1 %v1051_v41, %s1181_s11  ;;  %v1057_v21 = vpop.eup %1056  ;;  %v490_v41 = vmul.f32 %v1473_v43, %v468_v31 }
 0x151   : > { %v555_v14 = vadd.f32 %v1508_v32, %v549_v9  ;;  %v653_v11 = vadd.f32 %v1512_v17, %v647_v53 }
 0x153   : > { %v929_v19 = vmul.f32 -1.442695, %v555_v14  ;;  %v936_v23 = vmul.f32 -1.442695, %v653_v11 }
 0x154   : > { %739 = vrot.lane.b32.xlu0 %v1053_v42, %s1181_s11 }
 0x155   : > { %1058 = vpow2.f32 %v929_v19 }
 0x156   : > { %1060 = vpow2.f32 %v936_v23 }
 0x157   : > { %755 = vrot.lane.b32.xlu2 %v1055_v5, %s1181_s11 }
 0x15b   : > { %v1059_v26 = vpop.eup %1058 }
 0x15c   : > { %753 = vrot.lane.b32.xlu0 %v1057_v21, %s1181_s11  ;;  %v1531_v59 = vadd.f32 1.0, %v1059_v26  ;;  %v1061_v8 = vpop.eup %1060 }
 0x15e   : > { %1062 = vrcp.f32 %v1531_v59  ;;  %vm580_vm1 = vweird.f32 %v1531_v59 }
 0x167   : > { %v476_v2 = vpop.xlane.xlu2 %475 }
 0x168   : > { %v482_v60 = vmul.f32 0.008, %v476_v2 }
 0x169   : > { %v480_v15 = vpop.xlane.xlu1 %479 }
 0x16a   : > { %v494_v18 = vmul.f32 %v1480_v4, %v482_v60  ;;  %v520_v16 = vmul.f32 %v1482_v48, %v482_v60  ;;  %v484_v10 = vmul.f32 0.008, %v480_v15 }
 0x16c   : > { %v498_v30 = vadd.f32 %v494_v18, %v488_v20  ;;  %v524_v37 = vadd.f32 %v520_v16, %v514_v28  ;;  %v496_v39 = vmul.f32 %v1480_v4, %v484_v10  ;;  %v522_v36 = vmul.f32 %v1482_v48, %v484_v10  ;;  %v478_v40 = vpop.xlane.xlu0 %477  ;;  %v1549_v10 = vpop.eup %1062 }
 0x16d   : > { %v483_v49 = vmul.f32 0.008, %v478_v40  ;;  %vm581_vm2 = vweird.f32 %v1549_v10 }
 0x16e   : > { %v504_v42 = vadd.f32 %v1490_v24, %v498_v30  ;;  %v530_v45 = vadd.f32 %v1492_v58, %v524_v37  ;;  %v500_v46 = vadd.f32 %v496_v39, %v490_v41  ;;  %v526_v5 = vadd.f32 %v522_v36, %v516_v55  ;;  %vm1578_vm5 = vmor %vm580_vm1, %vm581_vm2 }
 0x16f   : > { %v495_v56 = vmul.f32 %v1480_v4, %v483_v49  ;;  %v521_v33 = vmul.f32 %v1482_v48, %v483_v49  ;;  %v1538_v4 = vadd.f32 1.0, %v1061_v8 }
 0x170   : > { %v508_v25 = vmax.f32 %v504_v42, 0.0  ;;  %v534_v27 = vmax.f32 %v530_v45, 0.0  ;;  %v506_v21 = vadd.f32 %v1490_v24, %v500_v46  ;;  %v532_v22 = vadd.f32 %v1492_v58, %v526_v5 }
 0x171   : > { %v499_v12 = vadd.f32 %v495_v56, %v489_v62  ;;  %v525_v57 = vadd.f32 %v521_v33, %v515_v63  ;;  %1064 = vrcp.f32 %v1538_v4  ;;  %v586_v33 = vand.u32 2147483648, %v1531_v59 }
 0x172   : > { %v540_v1 = vmul.f32 %v1496_v50, %v508_v25  ;;  %v546_v61 = vmul.f32 %v1498_v51, %v534_v27  ;;  %v510_v2 = vmax.f32 %v506_v21, 0.0  ;;  %v536_v9 = vmax.f32 %v532_v22, 0.0 }
 0x173   : > { %v638_v48 = vmul.f32 %v1502_v52, %v508_v25  ;;  %v644_v60 = vmul.f32 %v1504_v54, %v534_v27  ;;  %v505_v14 = vadd.f32 %v1490_v24, %v499_v12  ;;  %v531_v53 = vadd.f32 %v1492_v58, %v525_v57 }
 0x174   : > { %v550_v43 = vadd.f32 %v546_v61, %v540_v1  ;;  %v640_v47 = vmul.f32 %v1502_v52, %v510_v2  ;;  %v646_v13 = vmul.f32 %v1504_v54, %v536_v9  ;;  %v542_v15 = vmul.f32 %v1496_v50, %v510_v2 }
 0x175   : > { %v548_v18 = vmul.f32 %v1498_v51, %v536_v9  ;;  %v648_v16 = vadd.f32 %v644_v60, %v638_v48  ;;  %v509_v19 = vmax.f32 %v505_v14, 0.0  ;;  %v535_v11 = vmax.f32 %v531_v53, 0.0 }
 0x176   : > { %v556_v20 = vadd.f32 %v1508_v32, %v550_v43  ;;  %v650_v28 = vadd.f32 %v646_v13, %v640_v47  ;;  %v576_v24 = vmul.f32 %v1549_v10, %v1531_v59  ;;  %vm678_vm3 = vweird.f32 %v1538_v4 }
 0x177   : > { %v552_v31 = vadd.f32 %v548_v18, %v542_v15  ;;  %v654_v30 = vadd.f32 %v1512_v17, %v648_v16  ;;  %v1555_v58 = vpop.eup %1064  ;;  %v541_v36 = vmul.f32 %v1496_v50, %v509_v19  ;;  %v547_v23 = vmul.f32 %v1498_v51, %v535_v11 }
 0x178   : > { %v930_v37 = vmul.f32 -1.442695, %v556_v20  ;;  %v656_v39 = vadd.f32 %v1512_v17, %v650_v28  ;;  %v639_v55 = vmul.f32 %v1502_v52, %v509_v19  ;;  %v645_v42 = vmul.f32 %v1504_v54, %v535_v11 }
 0x179   : > { %v558_v40 = vadd.f32 %v1508_v32, %v552_v31  ;;  %v937_v41 = vmul.f32 -1.442695, %v654_v30  ;;  %v674_v45 = vmul.f32 %v1555_v58, %v1538_v4  ;;  %v551_v5 = vadd.f32 %v547_v23, %v541_v36 }
 0x17a   : > { %1066 = vpow2.f32 %v930_v37  ;;  %v939_v46 = vmul.f32 -1.442695, %v656_v39  ;;  %v577_v49 = vsub.f32 1.0, %v576_v24  ;;  %v649_v26 = vadd.f32 %v645_v42, %v639_v55 }
 0x17b   : > { %v932_v0 = vmul.f32 -1.442695, %v558_v40  ;;  %1068 = vpow2.f32 %v937_v41  ;;  %v675_v50 = vsub.f32 1.0, %v674_v45  ;;  %v557_v51 = vadd.f32 %v1508_v32, %v551_v5 }
 0x17c   : > { %1070 = vpow2.f32 %v939_v46  ;;  %v578_v25 = vmul.f32 %v1549_v10, %v577_v49  ;;  %v655_v54 = vadd.f32 %v1512_v17, %v649_v26  ;;  %v584_v32 = vand.u32 2147483647, %v1531_v59 }
 0x17d   : > { %1072 = vpow2.f32 %v932_v0  ;;  %v676_v27 = vmul.f32 %v1555_v58, %v675_v50  ;;  %v931_v22 = vmul.f32 -1.442695, %v557_v51  ;;  %vm679_vm4 = vweird.f32 %v1555_v58 }
 0x17e   : > { %v579_v56 = vadd.f32 %v1549_v10, %v578_v25  ;;  %v938_v63 = vmul.f32 -1.442695, %v655_v54  ;;  %v684_v1 = vand.u32 2147483648, %v1538_v4  ;;  %v682_v12 = vand.u32 2147483647, %v1538_v4  ;;  %vm1587_vm6 = vmor %vm678_vm3, %vm679_vm4 }
 0x17f   : > { %v677_v9 = vadd.f32 %v1555_v58, %v676_v27  ;;  %1074 = vpow2.f32 %v931_v22  ;;  %v587_v59 = vor.u32 1.1754944e-38, %v586_v33  ;;  %vm585_vm7 = vcmp.eq.f32.partialorder %v584_v32, 8.507059e+37 }
 0x180   : > { %v1067_v52 = vpop.eup %1066  ;;  %v583_v60 = vsel %vm1578_vm5, %v1549_v10, %v579_v56  ;;  %v685_v47 = vor.u32 1.1754944e-38, %v684_v1  ;;  %vm683_vm8 = vcmp.eq.f32.partialorder %v682_v12, 8.507059e+37  ;;  %v1613_v31 = vstv %s940_s5 }
 0x181   : > { %v1069_v21 = vpop.eup %1068  ;;  %v1573_v62 = vadd.f32 1.0, %v1067_v52  ;;  %v681_v13 = vsel %vm1587_vm6, %v1555_v58, %v677_v9  ;;  %v588_v14 = vsel %vm585_vm7, %v587_v59, %v583_v60  ;;  %v1615_v30 = vstv %s941_s6 }
 0x182   : > { %v1071_v17 = vpop.eup %1070  ;;  %v1583_v2 = vadd.f32 1.0, %v1069_v21  ;;  %v686_v15 = vsel %vm683_vm8, %v685_v47, %v681_v13  ;;  %v741_v16 = vmul.f32 %v1340_v34, %v588_v14  ;;  %v1631_v41 = vstv %s942_s7 }
 0x183   : > { %v1073_v61 = vpop.eup %1072  ;;  %1076 = vrcp.f32 %v1573_v62  ;;  %v1592_v48 = vadd.f32 1.0, %v1071_v17  ;;  %v757_v11 = vmul.f32 %v1350_v38, %v686_v15  ;;  %v599_v54 = vand.u32 2147483647, %v1573_v62 }
 0x184   : > { %v1597_v43 = vadd.f32 1.0, %v1073_v61  ;;  %1078 = vpow2.f32 %v938_v63  ;;  %v601_v27 = vand.u32 2147483648, %v1573_v62  ;;  %vm595_vm10 = vweird.f32 %v1573_v62 }
 0x185   : > { %1080 = vrcp.f32 %v1583_v2  ;;  %v1075_v53 = vpop.eup %1074  ;;  %vm693_vm11 = vweird.f32 %v1583_v2  ;;  %vm1666_vm14 = vcmp.eq.f32.partialorder %v599_v54, 8.507059e+37  ;;  %v697_v1 = vand.u32 2147483647, %v1583_v2 }
 0x186   : > { %1082 = vrcp.f32 %v1592_v48  ;;  %v1610_v28 = vadd.f32 1.0, %v1075_v53  ;;  %v699_v61 = vand.u32 2147483648, %v1583_v2  ;;  %vm723_vm0 = vweird.f32 %v1592_v48 }
 0x187   : > { %1084 = vrcp.f32 %v1597_v43  ;;  %v729_v57 = vand.u32 2147483648, %v1592_v48  ;;  %v727_v13 = vand.u32 2147483647, %v1592_v48  ;;  %v631_v53 = vand.u32 2147483648, %v1597_v43 }
 0x188   : > { %1086 = vrcp.f32 %v1610_v28  ;;  %vm625_vm4 = vweird.f32 %v1597_v43  ;;  %vm698_vm5 = vcmp.eq.f32.partialorder %v697_v1, 8.507059e+37 }
 0x189   : > { %v1605_v18 = vpop.eup %1076  ;;  %vm728_vm7 = vcmp.eq.f32.partialorder %v727_v13, 8.507059e+37 }
 0x18a   : > { %v1079_v10 = vpop.eup %1078  ;;  %v591_v58 = vmul.f32 %v1605_v18, %v1573_v62  ;;  %vm596_vm9 = vweird.f32 %v1605_v18  ;;  %v602_v62 = vor.u32 1.1754944e-38, %v601_v27 }
 0x18b   : > { %v1608_v20 = vpop.eup %1080  ;;  %v1621_v34 = vadd.f32 1.0, %v1079_v10  ;;  %vm1662_vm13 = vmor %vm595_vm10, %vm596_vm9  ;;  %v629_v10 = vand.u32 2147483647, %v1597_v43  ;;  %vm610_vm10 = vweird.f32 %v1610_v28 }
 0x18c   : > { %v1619_v37 = vpop.eup %1082  ;;  %v689_v23 = vmul.f32 %v1608_v20, %v1583_v2  ;;  %v592_v42 = vsub.f32 1.0, %v591_v58  ;;  %vm694_vm12 = vweird.f32 %v1608_v20 }
 0x18d   : > { %v1623_v36 = vpop.eup %1084  ;;  %v719_v55 = vmul.f32 %v1619_v37, %v1592_v48  ;;  %1088 = vrcp.f32 %v1621_v34  ;;  %vm724_vm15 = vweird.f32 %v1619_v37  ;;  %vm1683_vm1 = vmor %vm693_vm11, %vm694_vm12  ;;  %vm630_vm9 = vcmp.eq.f32.partialorder %v629_v10, 8.507059e+37 }
 0x18e   : > { %v621_v46 = vmul.f32 %v1623_v36, %v1597_v43  ;;  %v690_v5 = vsub.f32 1.0, %v689_v23  ;;  %v593_v26 = vmul.f32 %v1605_v18, %v592_v42  ;;  %v1640_v50 = vpop.eup %1086  ;;  %vm626_vm2 = vweird.f32 %v1623_v36  ;;  %vm1694_vm3 = vmor %vm723_vm0, %vm724_vm15 }
 0x18f   : > { %v720_v0 = vsub.f32 1.0, %v719_v55  ;;  %v606_v22 = vmul.f32 %v1640_v50, %v1610_v28  ;;  %vm1706_vm6 = vmor %vm625_vm4, %vm626_vm2  ;;  %v632_v23 = vor.u32 1.1754944e-38, %v631_v53  ;;  %vm611_vm8 = vweird.f32 %v1640_v50 }
 0x190   : > { %v622_v51 = vsub.f32 1.0, %v621_v46  ;;  %v691_v25 = vmul.f32 %v1608_v20, %v690_v5  ;;  %v594_v56 = vadd.f32 %v1605_v18, %v593_v26  ;;  %vm1726_vm12 = vmor %vm610_vm10, %vm611_vm8 }
 0x191   : > { %v721_v21 = vmul.f32 %v1619_v37, %v720_v0  ;;  %v607_v12 = vsub.f32 1.0, %v606_v22 }
 0x192   : > { %v623_v33 = vmul.f32 %v1623_v36, %v622_v51  ;;  %v692_v32 = vadd.f32 %v1608_v20, %v691_v25  ;;  %v598_v59 = vsel %vm1662_vm13, %v1605_v18, %v594_v56  ;;  %vm708_vm13 = vweird.f32 %v1621_v34 }
 0x193   : > { %v1646_v52 = vpop.eup %1088  ;;  %v722_v9 = vadd.f32 %v1619_v37, %v721_v21  ;;  %v603_v2 = vsel %vm1666_vm14, %v602_v62, %v598_v59  ;;  %v714_v25 = vand.u32 2147483648, %v1621_v34 }
 0x194   : > { %v704_v17 = vmul.f32 %v1646_v52, %v1621_v34  ;;  %v624_v47 = vadd.f32 %v1623_v36, %v623_v33  ;;  %v696_v14 = vsel %vm1683_vm1, %v1608_v20, %v692_v32  ;;  %v608_v20 = vmul.f32 %v1640_v50, %v607_v12 }
 0x195   : > { %v726_v48 = vsel %vm1694_vm3, %v1619_v37, %v722_v9  ;;  %v742_v43 = vmul.f32 %v1331_v29, %v603_v2  ;;  %v616_v29 = vand.u32 2147483648, %v1610_v28  ;;  %vm709_vm11 = vweird.f32 %v1646_v52 }
 0x196   : > { %v705_v15 = vsub.f32 1.0, %v704_v17  ;;  %vm710_vm14 = vmor %vm708_vm13, %vm709_vm11  ;;  %v715_v17 = vor.u32 1.1754944e-38, %v714_v25 }
 0x197   : > { %v617_v22 = vor.u32 1.1754944e-38, %v616_v29 }
 0x198   : > { %v706_v37 = vmul.f32 %v1646_v52, %v705_v15 }
 0x19a   : > { %v707_v26 = vadd.f32 %v1646_v52, %v706_v37 }
 0x19c   : > { %v711_v32 = vsel %vm710_vm14, %v1646_v52, %v707_v26 }
 0x1a1   : > { %v734_v4 = vpop.permute.xlu2 %733 }
 0x1a2   : > { %v745_v19 = vadd.f32 %v741_v16, %v734_v4  ;;  %v700_v16 = vor.u32 1.1754944e-38, %v699_v61 }
 0x1a4   : > { %v767_v38 = vmul.f32 %v1613_v31, %v745_v19  ;;  %v701_v58 = vsel %vm698_vm5, %v700_v16, %v696_v14 }
 0x1a5   : > { %v758_v42 = vmul.f32 %v1428_v3, %v701_v58 }
 0x1a9   : > { %v750_v24 = vpop.permute.xlu2 %749 }
 0x1aa   : > { %v761_v39 = vadd.f32 %v757_v11, %v750_v24  ;;  %v730_v11 = vor.u32 1.1754944e-38, %v729_v57 }
 0x1ac   : > { %v773_v40 = vmul.f32 %v1615_v30, %v761_v39  ;;  %v628_v39 = vsel %vm1706_vm6, %v1623_v36, %v624_v47  ;;  %v614_v36 = vand.u32 2147483647, %v1610_v28  ;;  %v712_v28 = vand.u32 2147483647, %v1621_v34 }
 0x1ae   : > { %v777_v45 = vadd.f32 %v773_v40, %v767_v38  ;;  %v731_v38 = vsel %vm728_vm7, %v730_v11, %v726_v48  ;;  %v609_v40 = vadd.f32 %v1640_v50, %v608_v20  ;;  %vm615_vm15 = vcmp.eq.f32.partialorder %v614_v36, 8.507059e+37 }
 0x1af   : > { %vm713_vm0 = vcmp.eq.f32.partialorder %v712_v28, 8.507059e+37 }
 0x1b0   : > { %v783_v49 = vadd.f32 %v1631_v41, %v777_v45  ;;  %v633_v45 = vsel %vm630_vm9, %v632_v23, %v628_v39  ;;  %v613_v54 = vsel %vm1726_vm12, %v1640_v50, %v609_v40  ;;  %v716_v62 = vsel %vm713_vm0, %v715_v17, %v711_v32 }
 0x1b1   : > { %v756_v46 = vpop.permute.xlu2 %755  ;;  %v744_v51 = vmul.f32 %v1342_v35, %v633_v45  ;;  %v618_v34 = vsel %vm615_vm15, %v617_v22, %v613_v54  ;;  %v759_v12 = vmul.f32 %v1435_v7, %v716_v62 }
 0x1b2   : > { %787 = vst [vmem:[%s1642_s9] sm:$0xff] %v783_v49  ;;  %v760_v49 = vmul.f32 %v1430_v6, %v731_v38  ;;  %v743_v1 = vmul.f32 %v1357_v44, %v618_v34 }
 0x1b4   : > { %v764_v6 = vadd.f32 %v760_v49, %v756_v46 }
 0x1b6   : > { %v776_v63 = vmul.f32 %v1615_v30, %v764_v6 }
 0x1ba   : > { %v1679_v60 = vpop.permute.xlu1 %737 }
 0x1bb   : > { %v747_v52 = vadd.f32 %v743_v1, %v1679_v60 }
 0x1bd   : > { %v769_v44 = vmul.f32 %v1613_v31, %v747_v52 }
 0x1be   : > { %v736_v24 = vpop.permute.xlu0 %735 }
 0x1bf   : > { %v746_v55 = vadd.f32 %v742_v43, %v736_v24 }
 0x1c1   : > { %v768_v27 = vmul.f32 %v1613_v31, %v746_v55 }
 0x1c2   : > { %v752_v5 = vpop.permute.xlu1 %751 }
 0x1c3   : > { %v762_v0 = vadd.f32 %v758_v42, %v752_v5 }
 0x1c5   : > { %v774_v21 = vmul.f32 %v1615_v30, %v762_v0 }
 0x1c6   : > { %v740_v56 = vpop.permute.xlu0 %739 }
 0x1c7   : > { %v778_v35 = vadd.f32 %v774_v21, %v768_v27  ;;  %v748_v33 = vadd.f32 %v744_v51, %v740_v56 }
 0x1c9   : > { %v784_v50 = vadd.f32 %v1631_v41, %v778_v35  ;;  %v770_v8 = vmul.f32 %v1613_v31, %v748_v33 }
 0x1cb   : > { %788 = vst [vmem:[%s1642_s9 + $0x8] sm:$0xff] %v784_v50  ;;  %v780_v61 = vadd.f32 %v776_v63, %v770_v8 }
 0x1cd   : > { %v786_v9 = vadd.f32 %v1631_v41, %v780_v61 }
 0x1ce   : > { %v754_v59 = vpop.permute.xlu0 %753 }
 0x1cf   : > { %790 = vst [vmem:[%s1642_s9 + $0x18] sm:$0xff] %v786_v9  ;;  %v763_v57 = vadd.f32 %v759_v12, %v754_v59 }
 0x1d1   : > { %v775_v4 = vmul.f32 %v1615_v30, %v763_v57 }
 0x1d3   : > { %v779_v60 = vadd.f32 %v775_v4, %v769_v44 }
 0x1d5   : > { %v785_v47 = vadd.f32 %v1631_v41, %v779_v60 }
 0x1d7   : > { %789 = vst [vmem:[%s1642_s9 + $0x10] sm:$0xff] %v785_v47 }
 0x1d8   : > { %1129 = shalt.err (!%p1126_p7)
}
 0x1d9   : > { %s1182_s29 = smov 128   ;;  %s1183_s26 = smov 8  }
 0x1da   : > { %959 = dma.vmem_to_hbm [thread:$0]  (%p1250_p9), %s805_s19, 512, %s807_s0, %s792_s20, %s1182_s29, %s1182_s29, %s1183_s26  }
 0x1db PF: > { %p965_p8 = scmp.ge.s32.totalorder %s1170_s16, 2  ;;  %s821_s5 = sand.u32 1, %s1158_s13  }
 0x1dc   : > { %s822_s6 = scalar_lea.sflag [#allocation6], %s821_s5 }
 0x1dd   : > { %p962_p11 = pnand %p965_p8, %p1254_p10 }
 0x1df   : > { %p963_p12 = pneg %p962_p11 }
 0x1e1   : > { %1153 = dma.done.wait (%p963_p12), %s822_s6, 512  }
 0x1e2   : > { %1155 = vsyncadd (%p963_p12), %s822_s6, 4294966784  ;;  %p23_p13 = scmp.ge.s32.totalorder %s1227_s18, 6   ;;  %s1809_s13 = smov %s1162_s14 }
 0x1e3   : > { %s1810_s14 = smov %s1166_s15  ;;  %s1811_s15 = smov %s1239_s21 }
 0x1e4   : > { %s1812_s16 = smov %s1227_s18  ;;  %25 = sbr.rel (!%p23_p13) target bundleno = 11 (0xb), region = 75 }
 0x1e9   :  { %828 = vsyncpa [#allocation5], 1 }
 0x1ea   :  { %830 = vsyncpa [#allocation5 + $0x1], 1 }
 0x1eb   :  { %831 = vsyncpa [#allocation6], 1 }
 0x1ec   :  { %833 = vsyncpa [#allocation6 + $0x1], 1 }

</bundles_post_ra>
